<compile_context>
chip_gen: v7x
topology: tpu7x:2x2x1
jax: 0.10.0
libtpu: 0.0.40
codegen_flags: <defaults>
</compile_context>

<pallas_src>
import functools

import jax
import jax.numpy as jnp
from jax.experimental import pallas as pl
from jax.experimental.pallas import tpu as pltpu

LANES = 128
MAX_TILE_ROWS = 2048            # ~1 MiB / operand / grid step for f32
SMALL_INPUT_FASTPATH = 1 << 20  # below this many elements, plain XLA is cheaper


def _cdiv(a, b):
    return -(-a // b)


def _round_up(a, b):
    return _cdiv(a, b) * b


def _detect_num_core_splits() -> int:
    """2-way 'parallel' grid split only on dual-TensorCore chips; else 1."""
    try:
        dev = jax.devices()[0]
        if dev.platform != "tpu":
            return 1
        kind = str(getattr(dev, "device_kind", "")).lower()
        if "v7" in kind:
            return 2
        n = getattr(dev, "num_cores", None)
        if n is not None and int(n) >= 2:
            return 2
    except Exception:  # pragma: no cover - defensive; correctness unaffected
        pass
    return 1


NUM_CORE_SPLITS = _detect_num_core_splits()


def _build_ssd_call(dtype, n_elems, rows_valid, tile_rows, splits,
                    tiles_per_core, total_tiles):
    """Build the pallas_call computing per-core-split (8,128) partial SSDs."""
    needs_mask = splits * tiles_per_core * tile_rows > rows_valid
    last_tile = total_tiles - 1

    def kernel(o_ref, t_ref, m_ref, nt_out_ref, om_out_ref, nt_acc, om_acc):
        c = pl.program_id(0)            # core-split axis ("parallel")
        i = pl.program_id(1)            # reduction (row-tile) axis ("arbitrary")

        @pl.when(i == 0)
        def _():
            nt_acc[...] = jnp.zeros_like(nt_acc)
            om_acc[...] = jnp.zeros_like(om_acc)

        # Cast in vregs only; HBM traffic stays at the input dtype.
        o = o_ref[...].astype(jnp.float32)
        t = t_ref[...].astype(jnp.float32)
        m = m_ref[...].astype(jnp.float32)

        d_nt = o - t
        d_om = o - m
        sq_nt = d_nt * d_nt
        sq_om = d_om * d_om

        if needs_mask:
            # Zero out rows past the real data (static rows_valid); garbage in
            # ragged / clamped blocks cannot leak into the sums.
            row_base = (c * tiles_per_core + i) * tile_rows
            row_ids = jax.lax.broadcasted_iota(jnp.int32, (tile_rows, LANES), 0)
            valid = (row_base + row_ids) < rows_valid
            sq_nt = jnp.where(valid, sq_nt, 0.0)
            sq_om = jnp.where(valid, sq_om, 0.0)

        nt_acc[...] += sq_nt            # pure VPU elementwise accumulate
        om_acc[...] += sq_om

        @pl.when(i == pl.num_programs(1) - 1)
        def _():
            # Collapse (tile_rows,128) accumulator to an (8,128) partial so the
            # HBM writeback is ~KBs.  Leading-axis sum = cheap vector adds.
            nt_out_ref[...] = nt_acc[...].reshape(tile_rows // 8, 8, LANES).sum(axis=0)
            om_out_ref[...] = om_acc[...].reshape(tile_rows // 8, 8, LANES).sum(axis=0)

    def in_index(c, i):
        # Clamp so DMAs never target a block starting past the array end
        # (such grid steps are fully masked out above).
        return (jnp.minimum(c * tiles_per_core + i, last_tile), 0)

    in_spec = pl.BlockSpec((tile_rows, LANES), in_index)
    # Output partials: one (8,128) block per core split; block index depends
    # only on the parallel axis, so it is written back to HBM once per core.
    out_spec = pl.BlockSpec((8, LANES), lambda c, i: (c, 0))
    out_shape = jax.ShapeDtypeStruct((splits * 8, LANES), jnp.float32)

    itemsize = jnp.dtype(dtype).itemsize
    cost = pl.CostEstimate(
        flops=8 * n_elems,
        transcendentals=0,
        bytes_accessed=3 * n_elems * itemsize + 2 * splits * 8 * LANES * 4,
    )

    return pl.pallas_call(
        kernel,
        out_shape=(out_shape, out_shape),
        grid=(splits, tiles_per_core),
        in_specs=[in_spec, in_spec, in_spec],
        out_specs=(out_spec, out_spec),
        scratch_shapes=[
            pltpu.VMEM((tile_rows, LANES), jnp.float32),
            pltpu.VMEM((tile_rows, LANES), jnp.float32),
        ],
        compiler_params=pltpu.CompilerParams(
            dimension_semantics=("parallel", "arbitrary")),
        cost_estimate=cost,
    )


@functools.partial(jax.jit, static_argnames=("min_pallas_elems",))
def custom_loss(outputs, targets, outputs_masked_attention, *,
                min_pallas_elems=SMALL_INPUT_FASTPATH):
    if not (outputs.shape == targets.shape == outputs_masked_attention.shape):
        raise ValueError("custom_loss expects identically shaped inputs")

    n_elems = outputs.size
    n = jnp.float32(n_elems)

    if n_elems < min_pallas_elems:
        # Small-input fast path: fused XLA expression beats launch + reductions.
        o32 = outputs.astype(jnp.float32)
        ssd_nt = jnp.sum(jnp.square(o32 - targets.astype(jnp.float32)))
        ssd_om = jnp.sum(jnp.square(o32 - outputs_masked_attention.astype(jnp.float32)))
        return ssd_nt / n + n / ssd_om

    itemsize = jnp.dtype(outputs.dtype).itemsize
    sublane_align = 8 * max(1, 4 // itemsize)       # 8 f32, 16 bf16, 32 int8/fp8

    rows_valid = _cdiv(n_elems, LANES)              # rows containing real data
    tile_rows = min(MAX_TILE_ROWS, _round_up(rows_valid, sublane_align))
    tile_rows = _round_up(tile_rows, sublane_align)

    total_tiles = _cdiv(rows_valid, tile_rows)
    splits = max(1, min(NUM_CORE_SPLITS, total_tiles))
    tiles_per_core = _cdiv(total_tiles, splits)

    tail = rows_valid * LANES - n_elems             # static Python int

    def to_slab(x):
        flat = jnp.ravel(x)
        if tail:  # only copy when the last 128-lane row is partial
            flat = jnp.pad(flat, (0, tail))         # zero tail -> zero diffs
        return flat.reshape(rows_valid, LANES)

    ssd_call = _build_ssd_call(outputs.dtype, n_elems, rows_valid, tile_rows,
                               splits, tiles_per_core, total_tiles)
    nt_part, om_part = ssd_call(to_slab(outputs), to_slab(targets),
                                to_slab(outputs_masked_attention))

    ssd_nt = jnp.sum(nt_part)                       # tiny (splits*8,128) arrays
    ssd_om = jnp.sum(om_part)
    # Mean-reduction MSE semantics:  SSD_nt/N  +  1 / (SSD_om/N)
    # (returns inf when outputs == outputs_masked_attention, like the reference)
    return ssd_nt / n + n / ssd_om


def _reference(outputs, targets, outputs_masked_attention):
    mse_nt = jnp.mean(jnp.square(outputs - targets))
    mse_om = jnp.mean(jnp.square(outputs - outputs_masked_attention))
    return mse_nt + 1.0 / mse_om


if __name__ == "__main__":
    key = jax.random.PRNGKey(0)
    k1, k2, k3 = jax.random.split(key, 3)
    shape = (2, 4, 16, 16)  # (B, C, H, W)
    outputs = jax.random.normal(k1, shape, dtype=jnp.float32)
    targets = jax.random.normal(k2, shape, dtype=jnp.float32)
    outputs_masked = jax.random.normal(k3, shape, dtype=jnp.float32)

    ref = _reference(outputs, targets, outputs_masked)

    # Force the Pallas path even at this small demo shape.
    loss = custom_loss(outputs, targets, outputs_masked, min_pallas_elems=0)
    loss = jax.block_until_ready(loss)
    assert jnp.allclose(loss, ref, rtol=1e-5, atol=1e-5), (loss, ref)

    # Default call exercises the small-input XLA fast path; must agree too.
    loss_fast = jax.block_until_ready(custom_loss(outputs, targets, outputs_masked))
    assert jnp.allclose(loss_fast, ref, rtol=1e-5, atol=1e-5), (loss_fast, ref)

    print("KERNEL_OK")
</pallas_src>

<mosaic_0001>
module attributes {stable_mosaic.version = 11 : i64} {
  func.func @kernel(%arg0: i32, %arg1: i32, %arg2: memref<16x128xf32, #tpu.memory_space<vmem>>, %arg3: memref<16x128xf32, #tpu.memory_space<vmem>>, %arg4: memref<16x128xf32, #tpu.memory_space<vmem>>, %arg5: memref<8x128xf32, #tpu.memory_space<vmem>>, %arg6: memref<8x128xf32, #tpu.memory_space<vmem>>, %arg7: memref<16x128xf32, #tpu.memory_space<vmem>>, %arg8: memref<16x128xf32, #tpu.memory_space<vmem>>) attributes {dimension_semantics = [#tpu.dimension_semantics<parallel>, #tpu.dimension_semantics<arbitrary>], iteration_bounds = array<i64: 1, 1>, scalar_prefetch = 0 : i64, scratch_operands = 2 : i64, tpu.core_type = #tpu.core_type<tc>, window_params = [{transform_indices = @transform_0, window_bounds = array<i64: 16, 128>}, {transform_indices = @transform_1, window_bounds = array<i64: 16, 128>}, {transform_indices = @transform_2, window_bounds = array<i64: 16, 128>}, {transform_indices = @transform_3, window_bounds = array<i64: 8, 128>}, {transform_indices = @transform_4, window_bounds = array<i64: 8, 128>}]} {
    %c0_i32 = arith.constant 0 : i32
    %0 = arith.cmpi eq, %arg1, %c0_i32 : i32
    %1 = arith.extui %0 : i1 to i32
    %c0_i32_0 = arith.constant 0 : i32
    %2 = arith.cmpi ne, %1, %c0_i32_0 : i32
    scf.if %2 {
      %cst = arith.constant 0.000000e+00 : f32
      %19 = vector.broadcast %cst : f32 to vector<16x128xf32>
      %c0_16 = arith.constant 0 : index
      %c0_17 = arith.constant 0 : index
      %20 = vector.load %arg7[%c0_16, %c0_17] : memref<16x128xf32, #tpu.memory_space<vmem>>, vector<16x128xf32>
      tpu.vector_store %arg7[%c0_16, %c0_17], %19 {strides = array<i32>} : memref<16x128xf32, #tpu.memory_space<vmem>>, vector<16x128xf32>,
      %cst_18 = arith.constant 0.000000e+00 : f32
      %21 = vector.broadcast %cst_18 : f32 to vector<16x128xf32>
      %c0_19 = arith.constant 0 : index
      %c0_20 = arith.constant 0 : index
      %22 = vector.load %arg8[%c0_19, %c0_20] : memref<16x128xf32, #tpu.memory_space<vmem>>, vector<16x128xf32>
      tpu.vector_store %arg8[%c0_19, %c0_20], %21 {strides = array<i32>} : memref<16x128xf32, #tpu.memory_space<vmem>>, vector<16x128xf32>,
    } else {
    }
    %c0 = arith.constant 0 : index
    %c0_1 = arith.constant 0 : index
    %3 = vector.load %arg2[%c0, %c0_1] : memref<16x128xf32, #tpu.memory_space<vmem>>, vector<16x128xf32>
    %c0_2 = arith.constant 0 : index
    %c0_3 = arith.constant 0 : index
    %4 = vector.load %arg3[%c0_2, %c0_3] : memref<16x128xf32, #tpu.memory_space<vmem>>, vector<16x128xf32>
    %c0_4 = arith.constant 0 : index
    %c0_5 = arith.constant 0 : index
    %5 = vector.load %arg4[%c0_4, %c0_5] : memref<16x128xf32, #tpu.memory_space<vmem>>, vector<16x128xf32>
    %6 = arith.subf %3, %4 : vector<16x128xf32>
    %7 = arith.subf %3, %5 : vector<16x128xf32>
    %8 = arith.mulf %6, %6 : vector<16x128xf32>
    %9 = arith.mulf %7, %7 : vector<16x128xf32>
    %c0_6 = arith.constant 0 : index
    %c0_7 = arith.constant 0 : index
    %10 = vector.load %arg7[%c0_6, %c0_7] : memref<16x128xf32, #tpu.memory_space<vmem>>, vector<16x128xf32>
    %11 = arith.addf %10, %8 : vector<16x128xf32>
    %c0_8 = arith.constant 0 : index
    %c0_9 = arith.constant 0 : index
    %12 = vector.load %arg7[%c0_8, %c0_9] : memref<16x128xf32, #tpu.memory_space<vmem>>, vector<16x128xf32>
    tpu.vector_store %arg7[%c0_8, %c0_9], %11 {strides = array<i32>} : memref<16x128xf32, #tpu.memory_space<vmem>>, vector<16x128xf32>,
    %c0_10 = arith.constant 0 : index
    %c0_11 = arith.constant 0 : index
    %13 = vector.load %arg8[%c0_10, %c0_11] : memref<16x128xf32, #tpu.memory_space<vmem>>, vector<16x128xf32>
    %14 = arith.addf %13, %9 : vector<16x128xf32>
    %c0_12 = arith.constant 0 : index
    %c0_13 = arith.constant 0 : index
    %15 = vector.load %arg8[%c0_12, %c0_13] : memref<16x128xf32, #tpu.memory_space<vmem>>, vector<16x128xf32>
    tpu.vector_store %arg8[%c0_12, %c0_13], %14 {strides = array<i32>} : memref<16x128xf32, #tpu.memory_space<vmem>>, vector<16x128xf32>,
    %c0_i32_14 = arith.constant 0 : i32
    %16 = arith.cmpi eq, %arg1, %c0_i32_14 : i32
    %17 = arith.extui %16 : i1 to i32
    %c0_i32_15 = arith.constant 0 : i32
    %18 = arith.cmpi ne, %17, %c0_i32_15 : i32
    scf.if %18 {
      %c0_16 = arith.constant 0 : index
      %c0_17 = arith.constant 0 : index
      %19 = vector.load %arg7[%c0_16, %c0_17] : memref<16x128xf32, #tpu.memory_space<vmem>>, vector<16x128xf32>
      %20 = vector.shape_cast %19 : vector<16x128xf32> to vector<2x8x128xf32>
      %cst = arith.constant dense<0.000000e+00> : vector<8x128xf32>
      %21 = vector.multi_reduction <add>, %20, %cst [0] : vector<2x8x128xf32> to vector<8x128xf32>
      %c0_18 = arith.constant 0 : index
      %c0_19 = arith.constant 0 : index
      %22 = vector.load %arg5[%c0_18, %c0_19] : memref<8x128xf32, #tpu.memory_space<vmem>>, vector<8x128xf32>
      tpu.vector_store %arg5[%c0_18, %c0_19], %21 {strides = array<i32>} : memref<8x128xf32, #tpu.memory_space<vmem>>, vector<8x128xf32>,
      %c0_20 = arith.constant 0 : index
      %c0_21 = arith.constant 0 : index
      %23 = vector.load %arg8[%c0_20, %c0_21] : memref<16x128xf32, #tpu.memory_space<vmem>>, vector<16x128xf32>
      %24 = vector.shape_cast %23 : vector<16x128xf32> to vector<2x8x128xf32>
      %cst_22 = arith.constant dense<0.000000e+00> : vector<8x128xf32>
      %25 = vector.multi_reduction <add>, %24, %cst_22 [0] : vector<2x8x128xf32> to vector<8x128xf32>
      %c0_23 = arith.constant 0 : index
      %c0_24 = arith.constant 0 : index
      %26 = vector.load %arg6[%c0_23, %c0_24] : memref<8x128xf32, #tpu.memory_space<vmem>>, vector<8x128xf32>
      tpu.vector_store %arg6[%c0_23, %c0_24], %25 {strides = array<i32>} : memref<8x128xf32, #tpu.memory_space<vmem>>, vector<8x128xf32>,
    } else {
    }
    return
  }
  func.func @transform_0(%arg0: i32, %arg1: i32) -> (i32, i32) {
    %c1_i32 = arith.constant 1 : i32
    %0 = arith.muli %arg0, %c1_i32 : i32
    %1 = arith.addi %0, %arg1 : i32
    %c0_i32 = arith.constant 0 : i32
    %2 = arith.minsi %1, %c0_i32 : i32
    %c0_i32_0 = arith.constant 0 : i32
    %c0_i32_1 = arith.constant 0 : i32
    return %2, %c0_i32_0 : i32, i32
  }
  func.func @transform_1(%arg0: i32, %arg1: i32) -> (i32, i32) {
    %c1_i32 = arith.constant 1 : i32
    %0 = arith.muli %arg0, %c1_i32 : i32
    %1 = arith.addi %0, %arg1 : i32
    %c0_i32 = arith.constant 0 : i32
    %2 = arith.minsi %1, %c0_i32 : i32
    %c0_i32_0 = arith.constant 0 : i32
    %c0_i32_1 = arith.constant 0 : i32
    return %2, %c0_i32_0 : i32, i32
  }
  func.func @transform_2(%arg0: i32, %arg1: i32) -> (i32, i32) {
    %c1_i32 = arith.constant 1 : i32
    %0 = arith.muli %arg0, %c1_i32 : i32
    %1 = arith.addi %0, %arg1 : i32
    %c0_i32 = arith.constant 0 : i32
    %2 = arith.minsi %1, %c0_i32 : i32
    %c0_i32_0 = arith.constant 0 : i32
    %c0_i32_1 = arith.constant 0 : i32
    return %2, %c0_i32_0 : i32, i32
  }
  func.func @transform_3(%arg0: i32, %arg1: i32) -> (i32, i32) {
    %c0_i32 = arith.constant 0 : i32
    %c0_i32_0 = arith.constant 0 : i32
    return %arg0, %c0_i32 : i32, i32
  }
  func.func @transform_4(%arg0: i32, %arg1: i32) -> (i32, i32) {
    %c0_i32 = arith.constant 0 : i32
    %c0_i32_0 = arith.constant 0 : i32
    return %arg0, %c0_i32 : i32, i32
  }
}

</mosaic_0001>

<bundles_post_ra>
// kernel: custom_loss.1
= control target key start
LH: loop header
LB: loop body
LE: loop exit
PB: predicated region body
PF: predicated region fallthrough
CT: control target
= control target key end

     0   :  { %s232_s0 = inlined_call_operand.vmem [shape: f32[16,128], index: 0, kind: input, shape index: {}]   ;;  %s233_s1 = inlined_call_operand.vmem [shape: f32[16,128], index: 1, kind: input, shape index: {}]   ;;  %s234_s2 = inlined_call_operand.vmem [shape: f32[16,128], index: 2, kind: input, shape index: {}]   ;;  %s235_s3 = inlined_call_operand.vmem [shape: f32[8,128], index: 3, kind: output, shape index: {0}]   ;;  %s236_s4 = inlined_call_operand.vmem [shape: f32[8,128], index: 4, kind: output, shape index: {1}]  }
   0x1   :  { %v120_v0 = vld [vmem:[%s232_s0] sm:$0xff]  ;;  %v121_v1 = vld [vmem:[%s232_s0 + $0x8] sm:$0xff] }
   0x2   :  { %v122_v2 = vld [vmem:[%s233_s1] sm:$0xff]  ;;  %v123_v3 = vld [vmem:[%s233_s1 + $0x8] sm:$0xff] }
   0x3   :  { %v126_v4 = vsub.f32 %v120_v0, %v122_v2  ;;  %v124_v5 = vld [vmem:[%s234_s2] sm:$0xff]  ;;  %v125_v6 = vld [vmem:[%s234_s2 + $0x8] sm:$0xff]  ;;  %v127_v7 = vsub.f32 %v121_v1, %v123_v3 }
   0x4   :  { %v128_v8 = vsub.f32 %v120_v0, %v124_v5  ;;  %v129_v9 = vsub.f32 %v121_v1, %v125_v6 }
   0x5   :  { %v130_v10 = vmul.f32 %v126_v4, %v126_v4  ;;  %v131_v11 = vmul.f32 %v127_v7, %v127_v7 }
   0x6   :  { %v132_v12 = vmul.f32 %v128_v8, %v128_v8  ;;  %v133_v13 = vmul.f32 %v129_v9, %v129_v9 }
   0x7   :  { %v151_v14 = vadd.f32 %v131_v11, %v130_v10 }
   0x8   :  { %v155_v15 = vadd.f32 %v133_v13, %v132_v12 }
   0x9   :  { %152 = vst [vmem:[%s235_s3] sm:$0xff] %v151_v14 }
   0xa   :  { %156 = vst [vmem:[%s236_s4] sm:$0xff] %v155_v15 }

</bundles_post_ra>
